<compile_context>
chip_gen: v7x
topology: tpu7x:2x2x1
jax: 0.10.0
libtpu: 0.0.40
codegen_flags: <defaults>
</compile_context>

<pallas_src>
import jax
import jax.numpy as jnp
from jax.experimental import pallas as pl
from jax.experimental.pallas import tpu as pltpu

HIDDEN = 512      # fixed by nn.Linear(512, 1) in the module
TM_MAX = 1024     # max token rows per tile (keeps working set ~8 MiB, v5e-safe)


def _round_up(x, m):
    return ((x + m - 1) // m) * m


def _default_act_dtype():
    """bf16 elementwise on chips with bf16 VPU/EUP (v6e/v7x), f32 otherwise."""
    try:
        kind = jax.devices()[0].device_kind.lower()
    except Exception:
        return jnp.bfloat16
    if any(v in kind for v in ("v2", "v3", "v4", "v5")):
        return jnp.float32
    return jnp.bfloat16


def _toxicity_head_kernel(emb_ref, mask_ref, wenc_ref, benc_ref, w1_ref,
                          out_ref, acc_ref):
    """One (core c, batch b, sequence-tile s) grid step.

    emb_ref  : (TS, H)        bf16     token-embedding tile (stand-in input)
    mask_ref : (1, 1, TS)     bf16     lane-dense attention-mask row
    wenc_ref : (H, H)         bf16     encoder projection weight (grid-const)
    benc_ref : (1, H)         bf16/f32 encoder projection bias (act dtype)
    w1_ref   : (1, H)         f32      h1 weight, lane-dense row layout
    out_ref  : (1, 1, 8, 128) f32      partial logit for this (core, batch)
    acc_ref  : (1, H)         f32      scratch: mask-weighted token sum
    """
    s = pl.program_id(2)
    ns = pl.num_programs(2)

    @pl.when(s == 0)
    def _():
        acc_ref[...] = jnp.zeros_like(acc_ref)

    # Encoder stand-in: bf16 MXU matmul, f32 accumulation.
    h = jnp.dot(emb_ref[...], wenc_ref[...],
                preferred_element_type=jnp.float32)
    # Bias + tanh in the bias dtype: bf16 on v6e/v7x (halves EUP pressure and
    # the live (TS,H) intermediate), f32 on v5e.  Numerically (not bit-)
    # equivalent to the f32 reference within ~1e-3.
    h = jnp.tanh(h.astype(benc_ref.dtype) + benc_ref[...])
    hb = h.astype(jnp.bfloat16)

    # Mask-weighted sequence reduction folded into the MXU: (1,TS)@(TS,H) adds
    # <1% extra MXU pushes and frees the VPU/XLU slots the old h*m +
    # cross-sublane sum burned.
    acc_ref[...] += jnp.dot(mask_ref[0], hb,
                            preferred_element_type=jnp.float32)

    @pl.when(s == ns - 1)
    def _():
        # 512 -> 1 head; b1 * sum(mask) and the sigmoid are applied in the
        # wrapper so per-core partial logits can be combined when NC == 2.
        part = jnp.sum(acc_ref[...] * w1_ref[...], axis=1, keepdims=True)
        out_ref[...] = jnp.broadcast_to(part.reshape(1, 1, 1, 1),
                                        out_ref.shape)


def t5_toxicity_regressor(input_ids, attention_mask, params, *,
                          max_rows_per_tile=TM_MAX, act_dtype=None):
    """Embedding lookup (XLA glue) + fused tiled Pallas head kernel -> (B,)."""
    emb_table, wenc, benc, w1, b1 = params
    B, S = input_ids.shape
    H = HIDDEN
    if act_dtype is None:
        act_dtype = _default_act_dtype()

    # Token-tile size: multiple of 16 sublanes (bf16 native (16,128) packing).
    max_rows = max(16, _round_up(min(max_rows_per_tile, TM_MAX), 16))
    if S <= max_rows:
        TS = _round_up(max(S, 16), 16)
    else:
        TS = max_rows
    NS = -(-S // TS)
    # v7x: when a single sequence cannot fill both TensorCores via the batch
    # axis, split the sequence reduction across a size-2 parallel core axis.
    NC = 2 if (B == 1 and NS >= 2) else 1
    if NS % NC:
        NS += 1
    NS2 = NS // NC
    S_pad = NS * TS
    pad = S_pad - S

    ids_p = jnp.pad(input_ids, ((0, 0), (0, pad)))
    mask_f = attention_mask.astype(jnp.float32)
    mask_p = jnp.pad(mask_f, ((0, 0), (0, pad)))

    # Glue: embedding gather stays in plain JAX (bf16 halves the HBM round
    # trip of the gathered activations, the dominant tensor).  Padded
    # positions gather row 0 but are zeroed by the mask in the MXU fold.
    # TODO(synk): gather embedding rows in-kernel via manual DMA to remove the
    # gathered-activation HBM round trip entirely.
    emb2d = emb_table.astype(jnp.bfloat16)[ids_p].reshape(B * S_pad, H)
    # Lane-dense mask rows: one contiguous (1,TS) copy per grid step (a (TS,1)
    # column block would pad to 128 lanes in VMEM and DMA 4 bytes per sublane).
    mask3d = mask_p.reshape(B * NS, 1, TS).astype(jnp.bfloat16)

    wenc_bf = wenc.astype(jnp.bfloat16)
    benc_k = benc.astype(act_dtype).reshape(1, H)
    w1_row = w1.astype(jnp.float32).reshape(1, H)      # lane-dense h1 weight

    cost = pl.CostEstimate(
        flops=2 * B * S_pad * H * H + 2 * B * S_pad * H,
        transcendentals=B * S_pad * H,
        bytes_accessed=(B * S_pad * H * 2            # bf16 embedding tiles
                        + B * NS * TS * 2            # bf16 mask rows
                        + H * H * 2 + 2 * H * 4      # weights / bias / head
                        + NC * B * 8 * 128 * 4),     # partial-logit blocks
    )

    part = pl.pallas_call(
        _toxicity_head_kernel,
        out_shape=jax.ShapeDtypeStruct((NC, B, 8, 128), jnp.float32),
        grid_spec=pltpu.PrefetchScalarGridSpec(
            num_scalar_prefetch=0,
            grid=(NC, B, NS2),
            in_specs=[
                pl.BlockSpec((TS, H),
                             lambda c, b, s: (b * NS + c * NS2 + s, 0)),
                pl.BlockSpec((1, 1, TS),
                             lambda c, b, s: (b * NS + c * NS2 + s, 0, 0)),
                # Grid-constant operands (resident across the whole grid).
                pl.BlockSpec((H, H), lambda c, b, s: (0, 0)),
                pl.BlockSpec((1, H), lambda c, b, s: (0, 0)),
                pl.BlockSpec((1, H), lambda c, b, s: (0, 0)),
            ],
            out_specs=pl.BlockSpec((1, 1, 8, 128),
                                   lambda c, b, s: (c, b, 0, 0)),
            scratch_shapes=[pltpu.VMEM((1, H), jnp.float32)],
        ),
        compiler_params=pltpu.CompilerParams(
            dimension_semantics=("parallel", "parallel", "arbitrary"),
            vmem_limit_bytes=32 << 20),
        cost_estimate=cost,
    )(emb2d, mask3d, wenc_bf, benc_k, w1_row)

    # O(B) epilogue: combine per-core partial logits, add b1 * sum(mask)
    # (the h1 bias summed over unmasked tokens), sigmoid.
    logit = jnp.sum(part[:, :, 0, 0], axis=0) + b1[0] * jnp.sum(mask_f, axis=1)
    return jax.nn.sigmoid(logit)


def _reference(input_ids, attention_mask, params):
    """Pure-JAX f32 reference of the same forward semantics."""
    emb_table, wenc, benc, w1, b1 = params
    emb = emb_table[input_ids].astype(jnp.float32)
    encoded = jnp.tanh(emb @ wenc.astype(jnp.float32)
                       + benc.astype(jnp.float32))          # last_hidden_state
    x = encoded @ w1.astype(jnp.float32) + b1[0]             # (B, S, 1)
    return jax.nn.sigmoid(
        jnp.sum(x[:, :, 0] * attention_mask.astype(jnp.float32), axis=1))


def _init_params(key, vocab_size):
    k0, k1, k2, k3 = jax.random.split(key, 4)
    emb_table = (0.5 * jax.random.normal(k0, (vocab_size, HIDDEN),
                                         jnp.float32)).astype(jnp.bfloat16)
    wenc = (0.15 * jax.random.normal(k1, (HIDDEN, HIDDEN),
                                     jnp.float32)).astype(jnp.bfloat16)
    benc = 0.1 * jax.random.normal(k2, (1, HIDDEN), jnp.float32)
    w1 = 0.02 * jax.random.normal(k3, (HIDDEN, 1), jnp.float32)
    b1 = jnp.full((1,), 0.05, jnp.float32)
    return emb_table, wenc, benc, w1, b1


if __name__ == "__main__":
    key = jax.random.PRNGKey(0)
    kp, kid1, kid2, km = jax.random.split(key, 4)

    VOCAB = 32
    params = _init_params(kp, VOCAB)

    # Case 1: batch 2, short sequence (single tile per batch row).
    B1, S1 = 2, 8
    ids1 = jax.random.randint(kid1, (B1, S1), 0, VOCAB, dtype=jnp.int32)
    mask1 = jnp.array([[1] * S1, [1] * (S1 - 3) + [0] * 3], dtype=jnp.int32)
    out1 = jax.block_until_ready(t5_toxicity_regressor(ids1, mask1, params))
    ref1 = _reference(ids1, mask1, params)
    assert out1.shape == (B1,)
    # bf16 MXU/EUP vs f32 reference: numerically (not bit-) equivalent.
    assert jnp.allclose(out1, ref1, atol=1e-2, rtol=0), (out1, ref1)

    # Case 2: batch 1, longer sequence, small tiles -> multi-tile reduction
    # split across the size-2 parallel core axis (v7x dual-TC path; runs
    # sequentially and stays correct on 1-TC chips).
    B2, S2 = 1, 64
    ids2 = jax.random.randint(kid2, (B2, S2), 0, VOCAB, dtype=jnp.int32)
    mask2 = (jax.random.uniform(km, (B2, S2)) < 0.8).astype(jnp.int32)
    out2 = jax.block_until_ready(
        t5_toxicity_regressor(ids2, mask2, params, max_rows_per_tile=16))
    ref2 = _reference(ids2, mask2, params)
    assert out2.shape == (B2,)
    assert jnp.allclose(out2, ref2, atol=1e-2, rtol=0), (out2, ref2)

    print("KERNEL_OK")
</pallas_src>

<mosaic_0001>
module attributes {stable_mosaic.version = 11 : i64} {
  func.func @_toxicity_head_kernel(%arg0: i32, %arg1: i32, %arg2: i32, %arg3: memref<16x512xbf16, #tpu.memory_space<vmem>>, %arg4: memref<1x1x16xbf16, #tpu.memory_space<vmem>>, %arg5: memref<512x512xbf16, #tpu.memory_space<vmem>>, %arg6: memref<1x512xbf16, #tpu.memory_space<vmem>>, %arg7: memref<1x512xf32, #tpu.memory_space<vmem>>, %arg8: memref<1x1x8x128xf32, #tpu.memory_space<vmem>>, %arg9: memref<1x512xf32, #tpu.memory_space<vmem>>) attributes {dimension_semantics = [#tpu.dimension_semantics<parallel>, #tpu.dimension_semantics<parallel>, #tpu.dimension_semantics<arbitrary>], iteration_bounds = array<i64: 1, 2, 1>, scalar_prefetch = 0 : i64, scratch_operands = 1 : i64, tpu.core_type = #tpu.core_type<tc>, window_params = [{transform_indices = @transform_0, window_bounds = array<i64: 16, 512>}, {transform_indices = @transform_1, window_bounds = array<i64: 1, 1, 16>}, {pipeline_mode = #tpu.pipeline_mode<synchronous>, transform_indices = @transform_2, window_bounds = array<i64: 512, 512>}, {pipeline_mode = #tpu.pipeline_mode<synchronous>, transform_indices = @transform_3, window_bounds = array<i64: 1, 512>}, {pipeline_mode = #tpu.pipeline_mode<synchronous>, transform_indices = @transform_4, window_bounds = array<i64: 1, 512>}, {transform_indices = @transform_5, window_bounds = array<i64: 1, 1, 8, 128>}]} {
    %c0_i32 = arith.constant 0 : i32
    %0 = arith.cmpi eq, %arg2, %c0_i32 : i32
    %1 = arith.extui %0 : i1 to i32
    %c0_i32_0 = arith.constant 0 : i32
    %2 = arith.cmpi ne, %1, %c0_i32_0 : i32
    scf.if %2 {
      %cst_16 = arith.constant 0.000000e+00 : f32
      %20 = vector.broadcast %cst_16 : f32 to vector<1x512xf32>
      %c0_17 = arith.constant 0 : index
      %c0_18 = arith.constant 0 : index
      %21 = vector.load %arg9[%c0_17, %c0_18] : memref<1x512xf32, #tpu.memory_space<vmem>>, vector<1x512xf32>
      tpu.vector_store %arg9[%c0_17, %c0_18], %20 {strides = array<i32>} : memref<1x512xf32, #tpu.memory_space<vmem>>, vector<1x512xf32>,
    } else {
    }
    %c0 = arith.constant 0 : index
    %c0_1 = arith.constant 0 : index
    %3 = vector.load %arg3[%c0, %c0_1] : memref<16x512xbf16, #tpu.memory_space<vmem>>, vector<16x512xbf16>
    %c0_2 = arith.constant 0 : index
    %c0_3 = arith.constant 0 : index
    %4 = vector.load %arg5[%c0_2, %c0_3] : memref<512x512xbf16, #tpu.memory_space<vmem>>, vector<512x512xbf16>
    %cst = arith.constant dense<0.000000e+00> : vector<16x512xf32>
    %5 = tpu.matmul %3, %4, %cst {dimension_numbers = #tpu.dot_dimension_numbers<[1], [0], [0], [1], [0, 0, 1, 1], [], []>} : vector<16x512xbf16>, vector<512x512xbf16>, vector<16x512xf32> -> vector<16x512xf32>
    %6 = arith.truncf %5 : vector<16x512xf32> to vector<16x512xbf16>
    %c0_4 = arith.constant 0 : index
    %c0_5 = arith.constant 0 : index
    %7 = vector.load %arg6[%c0_4, %c0_5] : memref<1x512xbf16, #tpu.memory_space<vmem>>, vector<1x512xbf16>
    %8 = vector.broadcast %7 : vector<1x512xbf16> to vector<16x512xbf16>
    %9 = arith.addf %6, %8 : vector<16x512xbf16>
    %10 = math.tanh %9 : vector<16x512xbf16>
    %c0_6 = arith.constant 0 : index
    %c0_7 = arith.constant 0 : index
    %11 = vector.load %arg9[%c0_6, %c0_7] : memref<1x512xf32, #tpu.memory_space<vmem>>, vector<1x512xf32>
    %c0_8 = arith.constant 0 : index
    %c0_9 = arith.constant 0 : index
    %c0_10 = arith.constant 0 : index
    %12 = vector.load %arg4[%c0_8, %c0_9, %c0_10] : memref<1x1x16xbf16, #tpu.memory_space<vmem>>, vector<1x1x16xbf16>
    %13 = vector.shape_cast %12 : vector<1x1x16xbf16> to vector<1x16xbf16>
    %cst_11 = arith.constant dense<0.000000e+00> : vector<1x512xf32>
    %14 = tpu.matmul %13, %10, %cst_11 {dimension_numbers = #tpu.dot_dimension_numbers<[1], [0], [0], [1], [0, 0, 1, 1], [], []>} : vector<1x16xbf16>, vector<16x512xbf16>, vector<1x512xf32> -> vector<1x512xf32>
    %15 = arith.addf %11, %14 : vector<1x512xf32>
    %c0_12 = arith.constant 0 : index
    %c0_13 = arith.constant 0 : index
    %16 = vector.load %arg9[%c0_12, %c0_13] : memref<1x512xf32, #tpu.memory_space<vmem>>, vector<1x512xf32>
    tpu.vector_store %arg9[%c0_12, %c0_13], %15 {strides = array<i32>} : memref<1x512xf32, #tpu.memory_space<vmem>>, vector<1x512xf32>,
    %c0_i32_14 = arith.constant 0 : i32
    %17 = arith.cmpi eq, %arg2, %c0_i32_14 : i32
    %18 = arith.extui %17 : i1 to i32
    %c0_i32_15 = arith.constant 0 : i32
    %19 = arith.cmpi ne, %18, %c0_i32_15 : i32
    scf.if %19 {
      %c0_16 = arith.constant 0 : index
      %c0_17 = arith.constant 0 : index
      %20 = vector.load %arg9[%c0_16, %c0_17] : memref<1x512xf32, #tpu.memory_space<vmem>>, vector<1x512xf32>
      %c0_18 = arith.constant 0 : index
      %c0_19 = arith.constant 0 : index
      %21 = vector.load %arg7[%c0_18, %c0_19] : memref<1x512xf32, #tpu.memory_space<vmem>>, vector<1x512xf32>
      %22 = arith.mulf %20, %21 : vector<1x512xf32>
      %cst_20 = arith.constant dense<0.000000e+00> : vector<1xf32>
      %23 = vector.multi_reduction <add>, %22, %cst_20 [1] : vector<1x512xf32> to vector<1xf32>
      %24 = vector.shape_cast %23 : vector<1xf32> to vector<1x1xf32>
      %25 = vector.shape_cast %24 : vector<1x1xf32> to vector<1x1x1x1xf32>
      %26 = vector.shape_cast %25 : vector<1x1x1x1xf32> to vector<1x1x1x1xf32>
      %27 = vector.broadcast %26 : vector<1x1x1x1xf32> to vector<1x1x8x128xf32>
      %c0_21 = arith.constant 0 : index
      %c0_22 = arith.constant 0 : index
      %c0_23 = arith.constant 0 : index
      %c0_24 = arith.constant 0 : index
      %28 = vector.load %arg8[%c0_21, %c0_22, %c0_23, %c0_24] : memref<1x1x8x128xf32, #tpu.memory_space<vmem>>, vector<1x1x8x128xf32>
      tpu.vector_store %arg8[%c0_21, %c0_22, %c0_23, %c0_24], %27 {strides = array<i32>} : memref<1x1x8x128xf32, #tpu.memory_space<vmem>>, vector<1x1x8x128xf32>,
    } else {
    }
    return
  }
  func.func @transform_0(%arg0: i32, %arg1: i32, %arg2: i32) -> (i32, i32) {
    %c1_i32 = arith.constant 1 : i32
    %0 = arith.muli %arg1, %c1_i32 : i32
    %c1_i32_0 = arith.constant 1 : i32
    %1 = arith.muli %arg0, %c1_i32_0 : i32
    %2 = arith.addi %0, %1 : i32
    %3 = arith.addi %2, %arg2 : i32
    %c0_i32 = arith.constant 0 : i32
    %c0_i32_1 = arith.constant 0 : i32
    return %3, %c0_i32 : i32, i32
  }
  func.func @transform_1(%arg0: i32, %arg1: i32, %arg2: i32) -> (i32, i32, i32) {
    %c1_i32 = arith.constant 1 : i32
    %0 = arith.muli %arg1, %c1_i32 : i32
    %c1_i32_0 = arith.constant 1 : i32
    %1 = arith.muli %arg0, %c1_i32_0 : i32
    %2 = arith.addi %0, %1 : i32
    %3 = arith.addi %2, %arg2 : i32
    %c0_i32 = arith.constant 0 : i32
    %c0_i32_1 = arith.constant 0 : i32
    %c0_i32_2 = arith.constant 0 : i32
    return %3, %c0_i32, %c0_i32_1 : i32, i32, i32
  }
  func.func @transform_2(%arg0: i32, %arg1: i32, %arg2: i32) -> (i32, i32) {
    %c0_i32 = arith.constant 0 : i32
    %c0_i32_0 = arith.constant 0 : i32
    %c0_i32_1 = arith.constant 0 : i32
    return %c0_i32, %c0_i32_0 : i32, i32
  }
  func.func @transform_3(%arg0: i32, %arg1: i32, %arg2: i32) -> (i32, i32) {
    %c0_i32 = arith.constant 0 : i32
    %c0_i32_0 = arith.constant 0 : i32
    %c0_i32_1 = arith.constant 0 : i32
    return %c0_i32, %c0_i32_0 : i32, i32
  }
  func.func @transform_4(%arg0: i32, %arg1: i32, %arg2: i32) -> (i32, i32) {
    %c0_i32 = arith.constant 0 : i32
    %c0_i32_0 = arith.constant 0 : i32
    %c0_i32_1 = arith.constant 0 : i32
    return %c0_i32, %c0_i32_0 : i32, i32
  }
  func.func @transform_5(%arg0: i32, %arg1: i32, %arg2: i32) -> (i32, i32, i32, i32) {
    %c0_i32 = arith.constant 0 : i32
    %c0_i32_0 = arith.constant 0 : i32
    %c0_i32_1 = arith.constant 0 : i32
    return %arg0, %arg1, %c0_i32, %c0_i32_0 : i32, i32, i32, i32
  }
}

</mosaic_0001>

<bundles_post_ra>
// kernel: tpu_custom_call.1
= control target key start
LH: loop header
LB: loop body
LE: loop exit
PB: predicated region body
PF: predicated region fallthrough
CT: control target
= control target key end

     0   :  { %10 = vsyncpa [#allocation4], 0  ;;  %s2543_s0 = inlined_call_operand.hbm [shape: bf16[32,512], index: 0, kind: input, shape index: {}]   ;;  %s2544_s1 = inlined_call_operand.vmem [shape: bf16[2,1,16], index: 1, kind: input, shape index: {}]   ;;  %s2545_s2 = inlined_call_operand.hbm [shape: bf16[512,512], index: 2, kind: input, shape index: {}]   ;;  %s2546_s3 = inlined_call_operand.vmem [shape: bf16[1,512], index: 3, kind: input, shape index: {}]   ;;  %s2547_s4 = inlined_call_operand.vmem [shape: f32[1,512], index: 4, kind: input, shape index: {}]   ;;  %s2548_s5 = inlined_call_operand.hbm [shape: f32[1,2,8,128], index: 5, kind: output, shape index: {}]  }
   0x1   :  { %12 = vsyncpa [#allocation4 + $0x1], 0 }
   0x2   :  { %13 = vsyncpa [#allocation7], 0 }
   0x3   :  { %14 = vsyncpa [#allocation5], 0 }
   0x4   :  { %16 = vsyncpa [#allocation5 + $0x1], 0  ;;  %s2272_s18 = smov 0   ;;  %s2274_s19 = smov 0  }
   0x5   :  { %s2276_s20 = smov 0   ;;  %s2278_s21 = smov 0  }
   0x6   :  { %s2280_s22 = smov 0   ;;  %s2282_s23 = smov 0  }
   0x7 LB: > { %s1642_s24 = sadd.s32 4294967295, %s2232_s23   ;;  %s1643_s25 = sadd.s32 4294967294, %s2232_s23   ;;  %s2232_s23 = sphi %s2282_s23, %s22_s23   ;;  %s2228_s22 = sphi %s2280_s22, %s2576_s22   ;;  %s2224_s21 = sphi %s2278_s21, %s2575_s21   ;;  %s2220_s20 = sphi %s2276_s20, %s2574_s20   ;;  %s2216_s19 = sphi %s2274_s19, %s2573_s19   ;;  %s2212_s18 = sphi %s2272_s18, %s2572_s18  }
   0x8   : > { %p65_p0 = scmp.ne.s32.totalorder %s2216_s19, %s2212_s18  ;;  %p2306_p1 = scmp.eq.s32.totalorder %s1642_s24, 0 }
   0x9   : > { %p2310_p2 = scmp.eq.s32.totalorder %s1642_s24, 1  ;;  %p190_p3 = scmp.eq.s32.totalorder %s1643_s25, 1 }
   0xa   : > { %s2554_s26 = scalar_select %p2306_p1, 1, 0 }
   0xb   : > { %s2555_s27 = scalar_select %p2310_p2, 1, 0 }
   0xc   : > { %p2316_p4 = por %p2306_p1, %p65_p0  ;;  %p1644_p5 = scmp.ge.s32.totalorder %s2232_s23, 1 }
   0xd   : > { %p2321_p6 = por %p190_p3, %p65_p0  ;;  %p197_p7 = scmp.lt.s32.totalorder %s2232_s23, 3 }
   0xe   : > { %s2556_s28 = scalar_select %p2316_p4, 1, 0 }
   0xf   : > { %s2557_s29 = scalar_select %p2321_p6, 1, 0 }
  0x10   : > { %p2326_p8 = pnand %p1644_p5, %p197_p7  ;;  %s2234_s6 = smov [#allocation6]  }
  0x11   : > { %s209_s7 = sshll.u32 %s2234_s6, 4  ;;  %s37_s9 = sadd.s32 1, %s2228_s22  ;;  %s210_s7 = int_to_ptr.vmem [resolvable:$true] %s209_s7 }
  0x12   : > { %s2558_s30 = scalar_select %p2326_p8, 1, 0 }
  0x13   : > { %p1812_p9 = pneg %p2326_p8  ;;  %s2088_s12 = scalar_lea.hbm %s2545_s2, 16384 }
  0x14   : > { %p2089_p12 = scmp.ne.s32.totalorder %s2545_s2, %s2088_s12  ;;  %p2095_p5 = scmp.lt.u32.totalorder %s2088_s12, %s2545_s2 }
  0x15   : > { %p2335_p11 = pnand %p1812_p9, %p2306_p1 }
  0x17   : > { %p2090_p13 = pneg %p2335_p11 }
  0x19   : > { %p2091_p0 = pnand %p2090_p13, %p2089_p12 }
  0x1b   : > { %p2092_p3 = pneg %p2091_p0 }
  0x1d   : > { %p2097_p7 = pnand %p2095_p5, %p2092_p3 }
  0x1f   : > { %2100 = shalt.err (!%p2097_p7)
}
  0x20   : > { %s2101_s17 = scalar_lea.vmem %s210_s7, 16384  ;;  %p2109_p1 = scmp.lt.s32.totalorder %s210_s7, %s210_s7 }
  0x21   : > { %p2102_p9 = scmp.ne.s32.totalorder %s210_s7, %s2101_s17  ;;  %p2110_p4 = scmp.lt.s32.totalorder %s2101_s17, %s2101_s17 }
  0x23   : > { %p2104_p10 = pnand %p2102_p9, %p2090_p13  ;;  %p2111_p8 = por %p2110_p4, %p2109_p1 }
  0x25   : > { %p2105_p6 = pneg %p2104_p10 }
  0x27   : > { %p2112_p2 = pnand %p2111_p8, %p2105_p6 }
  0x29   : > { %2115 = shalt.err (!%p2112_p2)
}
  0x2a   : > { %s2553_s24 = smov 256   ;;  %s2236_s25 = smov 16  }
  0x2b   : > { %1815 = dma.hbm_to_vmem [thread:$0]  (!%p2335_p11), %s2545_s2, 16384, %s210_s7, [#allocation7], %s2553_s24, %s2553_s24, %s2236_s25  }
  0x2c   : > { %p39_p1 = scmp.ge.s32.totalorder %s37_s9, 2  ;;  %s52_s11 = sadd.s32 1, %s2220_s20 }
  0x2d   : > { %p59_p2 = scmp.ne.s32.totalorder %s2220_s20, %s2216_s19  ;;  %p60_p4 = scmp.eq.s32.totalorder %s2232_s23, 0 }
  0x2e   : > { %s2578_s9 = smov (%p39_p1, %s37_s9), 0  ;;  %p2561_p8 = scmp.ne.s32.totalorder %s2555_s27, 0 }
  0x2f   : > { %p2365_p6 = por %p60_p4, %p59_p2  ;;  %s49_s13 = ssub.s32 %s2228_s22, %s2578_s9 }
  0x30   : > { %p2371_p10 = por %p2561_p8, %p59_p2  ;;  %p1825_p12 = scmp.lt.s32.totalorder %s2232_s23, 2 }
  0x31   : > { %p50_p11 = scmp.eq.s32.totalorder %s49_s13, 0  ;;  %s229_s7 = sand.u32 1, %s2220_s20  }
  0x32   : > { %s1647_s14 = sshll.u32 %s229_s7, 5  ;;  %s1795_s16 = sshll.u32 %s2228_s22, 9 }
  0x33   : > { %s2380_s15 = scalar_select %p50_p11, %s2220_s20, %s52_s11  }
  0x34   : > { %s2386_s10 = scalar_lea.hbm %s2543_s0, %s1795_s16  ;;  %s233_s27 = scalar_lea.vmem [#allocation3], %s1647_s14 }
  0x35   : > { %s243_s24 = sshll.u32 %s233_s27, 4  ;;  %p2392_p13 = pnand %p1825_p12, %p2365_p6  ;;  %s2388_s24 = int_to_ptr.vmem [resolvable:$true] %s243_s24 }
  0x36   : > { %s2396_s11 = scalar_lea.sflag [#allocation4], %s229_s7  ;;  %s2116_s17 = scalar_lea.hbm %s2386_s10, 512 }
  0x37   : > { %p2117_p0 = scmp.ne.s32.totalorder %s2386_s10, %s2116_s17  ;;  %p2118_p3 = pneg %p2392_p13 }
  0x38   : > { %s2121_s12 = scalar_lea.hbm %s2543_s0, 1024  ;;  %p2122_p9 = scmp.lt.u32.totalorder %s2386_s10, %s2543_s0 }
  0x39   : > { %p2119_p5 = pnand %p2118_p3, %p2117_p0  ;;  %p2123_p1 = scmp.lt.u32.totalorder %s2121_s12, %s2116_s17 }
  0x3a   : > { %p2125_p4 = scmp.lt.u32.totalorder %s2116_s17, %s2386_s10 }
  0x3b   : > { %p2120_p7 = pneg %p2119_p5  ;;  %p2124_p2 = por %p2123_p1, %p2122_p9 }
  0x3d   : > { %p2126_p6 = por %p2125_p4, %p2124_p2 }
  0x3f   : > { %p2127_p8 = pnand %p2126_p6, %p2120_p7 }
  0x41   : > { %2130 = shalt.err (!%p2127_p8)
}
  0x42   : > { %s2131_s7 = scalar_lea.vmem %s2388_s24, 512  ;;  %s2237_s14 = smov [#allocation3]  }
  0x43   : > { %p2132_p12 = scmp.ne.s32.totalorder %s2388_s24, %s2131_s7  ;;  %s2136_s16 = sshll.u32 %s2237_s14, 4  ;;  %s2137_s16 = int_to_ptr.vmem [resolvable:$false] %s2136_s16 }
  0x44   : > { %s2138_s6 = scalar_lea.vmem %s2137_s16, 1024  ;;  %p2139_p5 = scmp.lt.s32.totalorder %s2388_s24, %s2137_s16 }
  0x45   : > { %p2134_p11 = pnand %p2132_p12, %p2118_p3  ;;  %p2140_p9 = scmp.lt.s32.totalorder %s2138_s6, %s2131_s7 }
  0x47   : > { %p2135_p0 = pneg %p2134_p11  ;;  %p2141_p1 = por %p2140_p9, %p2139_p5 }
  0x49   : > { %p2142_p2 = pnand %p2141_p1, %p2135_p0 }
  0x4b   : > { %2145 = shalt.err (!%p2142_p2)
}
  0x4c   : > { %s2564_s17 = smov 256   ;;  %p2565_p3 = scmp.ne.s32.totalorder %s2558_s30, 0 }
  0x4d   : > { %1819 = dma.hbm_to_vmem [thread:$0]  (!%p2392_p13), %s2386_s10, 512, %s2388_s24, %s2396_s11, %s2564_s17, %s2564_s17, %s2236_s25  }
  0x4e   : > { %265 = sbr.rel (%p2565_p3) target bundleno = 854 (0x356), region = 40  ;;  %s2430_s12 = sand.u32 (!%p2565_p3), 1, %s2216_s19  }
  0x4f   : > { %s1652_s27 = sshll.u32 (!%p2565_p3), %s2430_s12, 5  ;;  %s268_s7 = scalar_lea.sflag (!%p2565_p3), [#allocation4], %s2430_s12 }
  0x50   : > { %s2434_s14 = scalar_lea.vmem (!%p2565_p3), [#allocation3], %s1652_s27  ;;  %p2566_p7 = scmp.ne.s32.totalorder (!%p2565_p3), %s2556_s28, 0 }
  0x55   : > { %2199 = dma.done.wait (%p2566_p7), %s268_s7, 512  }
  0x56   : > { %2201 = vsyncadd (%p2566_p7), %s268_s7, 4294966784  ;;  %p2567_p13 = scmp.ne.s32.totalorder %s2554_s26, 0 }
  0x58   : > { %2203 = dma.done.wait (%p2567_p13), [#allocation7], 16384  }
  0x59   : > { %2205 = vsyncadd (%p2567_p13), [#allocation7], 4294950912  ;;  %v1882_v0 = vld [vmem:[#allocation6 + $0x4] ss:$16 sps:$4 sm:$0xff]   ;;  %v1884_v1 = vld [vmem:[#allocation6 + $0xc] ss:$16 sps:$4 sm:$0xff]  }
  0x5a   : > { %1119 = vmatprep.subr.bf16.mxu0 %v1882_v0  ;;  %v1886_v2 = vld [vmem:[#allocation6] ss:$16 sps:$4 sm:$0xff]   ;;  %v1887_v3 = vld [vmem:[#allocation6 + $0x8] ss:$16 sps:$4 sm:$0xff]   ;;  %1205 = vmatprep.subr.bf16.mxu1 %v1884_v1  ;;  %v1888_v4 = vld [vmem:[#allocation6 + $0x24] ss:$16 sps:$4 sm:$0xff]  }
  0x5b   : > { %1120 = vmatpush1.bf16.msra.mxu0 %v1886_v2  ;;  %1206 = vmatpush1.bf16.msra.mxu1 %v1887_v3  ;;  %v1890_v5 = vld [vmem:[#allocation6 + $0x2c] ss:$16 sps:$4 sm:$0xff]   ;;  %v1892_v6 = vld [vmem:[#allocation6 + $0x20] ss:$16 sps:$4 sm:$0xff]   ;;  %v1893_v7 = vld [vmem:[#allocation6 + $0x28] ss:$16 sps:$4 sm:$0xff]  }
  0x5c   : > { %1121 = vmatprep.subr.bf16.mxu0 %v1888_v4  ;;  %1207 = vmatprep.subr.bf16.mxu1 %v1890_v5  ;;  %v1894_v8 = vld [vmem:[#allocation6 + $0x44] ss:$16 sps:$4 sm:$0xff]   ;;  %v1896_v9 = vld [vmem:[#allocation6 + $0x4c] ss:$16 sps:$4 sm:$0xff]   ;;  %v1898_v10 = vld [vmem:[#allocation6 + $0x40] ss:$16 sps:$4 sm:$0xff]  }
  0x5d   : > { %v1899_v11 = vld [vmem:[#allocation6 + $0x48] ss:$16 sps:$4 sm:$0xff]   ;;  %v1900_v12 = vld [vmem:[#allocation6 + $0x64] ss:$16 sps:$4 sm:$0xff]   ;;  %v1902_v13 = vld [vmem:[#allocation6 + $0x6c] ss:$16 sps:$4 sm:$0xff]  }
  0x5e   : > { %v1904_v14 = vld [vmem:[#allocation6 + $0x60] ss:$16 sps:$4 sm:$0xff]   ;;  %v1905_v15 = vld [vmem:[#allocation6 + $0x68] ss:$16 sps:$4 sm:$0xff]   ;;  %v1906_v16 = vld [vmem:[#allocation6 + $0x84] ss:$16 sps:$4 sm:$0xff]  }
  0x5f   : > { %1122 = vmatpush1.bf16.msra.mxu0 %v1892_v6  ;;  %1208 = vmatpush1.bf16.msra.mxu1 %v1893_v7  ;;  %v1908_v17 = vld [vmem:[#allocation6 + $0x8c] ss:$16 sps:$4 sm:$0xff]   ;;  %v1910_v18 = vld [vmem:[#allocation6 + $0x80] ss:$16 sps:$4 sm:$0xff]   ;;  %v1911_v19 = vld [vmem:[#allocation6 + $0x88] ss:$16 sps:$4 sm:$0xff]  }
  0x60   : > { %1123 = vmatprep.subr.bf16.mxu0 %v1894_v8  ;;  %1209 = vmatprep.subr.bf16.mxu1 %v1896_v9  ;;  %v1912_v20 = vld [vmem:[#allocation6 + $0xa4] ss:$16 sps:$4 sm:$0xff]   ;;  %v1914_v21 = vld [vmem:[#allocation6 + $0xac] ss:$16 sps:$4 sm:$0xff]   ;;  %v1916_v22 = vld [vmem:[#allocation6 + $0xa0] ss:$16 sps:$4 sm:$0xff]  }
  0x61   : > { %v1917_v23 = vld [vmem:[#allocation6 + $0xa8] ss:$16 sps:$4 sm:$0xff]   ;;  %v1918_v24 = vld [vmem:[#allocation6 + $0xc4] ss:$16 sps:$4 sm:$0xff]   ;;  %v1920_v25 = vld [vmem:[#allocation6 + $0xcc] ss:$16 sps:$4 sm:$0xff]  }
  0x62   : > { %v1922_v26 = vld [vmem:[#allocation6 + $0xc0] ss:$16 sps:$4 sm:$0xff]   ;;  %v1923_v27 = vld [vmem:[#allocation6 + $0xc8] ss:$16 sps:$4 sm:$0xff]   ;;  %v1924_v28 = vld [vmem:[#allocation6 + $0xe4] ss:$16 sps:$4 sm:$0xff]  }
  0x63   : > { %1124 = vmatpush1.bf16.msra.mxu0 %v1898_v10  ;;  %1210 = vmatpush1.bf16.msra.mxu1 %v1899_v11  ;;  %v1926_v29 = vld [vmem:[#allocation6 + $0xec] ss:$16 sps:$4 sm:$0xff]   ;;  %v1928_v30 = vld [vmem:[#allocation6 + $0xe0] ss:$16 sps:$4 sm:$0xff]   ;;  %v1929_v31 = vld [vmem:[#allocation6 + $0xe8] ss:$16 sps:$4 sm:$0xff]  }
  0x64   : > { %1125 = vmatprep.subr.bf16.mxu0 %v1900_v12  ;;  %1211 = vmatprep.subr.bf16.mxu1 %v1902_v13  ;;  %v1930_v32 = vld [vmem:[#allocation6 + $0x104] ss:$16 sps:$4 sm:$0xff]   ;;  %v1932_v33 = vld [vmem:[#allocation6 + $0x10c] ss:$16 sps:$4 sm:$0xff]   ;;  %v1934_v34 = vld [vmem:[#allocation6 + $0x100] ss:$16 sps:$4 sm:$0xff]  }
  0x65   : > { %v1935_v35 = vld [vmem:[#allocation6 + $0x108] ss:$16 sps:$4 sm:$0xff]   ;;  %v1936_v36 = vld [vmem:[#allocation6 + $0x124] ss:$16 sps:$4 sm:$0xff]   ;;  %v1938_v37 = vld [vmem:[#allocation6 + $0x12c] ss:$16 sps:$4 sm:$0xff]  }
  0x66   : > { %v1940_v38 = vld [vmem:[#allocation6 + $0x120] ss:$16 sps:$4 sm:$0xff]   ;;  %v1941_v39 = vld [vmem:[#allocation6 + $0x128] ss:$16 sps:$4 sm:$0xff]   ;;  %v1942_v40 = vld [vmem:[#allocation6 + $0x144] ss:$16 sps:$4 sm:$0xff]  }
  0x67   : > { %1126 = vmatpush1.bf16.msra.mxu0 %v1904_v14  ;;  %1212 = vmatpush1.bf16.msra.mxu1 %v1905_v15  ;;  %v1944_v41 = vld [vmem:[#allocation6 + $0x14c] ss:$16 sps:$4 sm:$0xff]   ;;  %v1946_v42 = vld [vmem:[#allocation6 + $0x140] ss:$16 sps:$4 sm:$0xff]   ;;  %v1947_v43 = vld [vmem:[#allocation6 + $0x148] ss:$16 sps:$4 sm:$0xff]  }
  0x68   : > { %1127 = vmatprep.subr.bf16.mxu0 %v1906_v16  ;;  %1213 = vmatprep.subr.bf16.mxu1 %v1908_v17  ;;  %v1948_v44 = vld [vmem:[#allocation6 + $0x164] ss:$16 sps:$4 sm:$0xff]   ;;  %v1950_v45 = vld [vmem:[#allocation6 + $0x16c] ss:$16 sps:$4 sm:$0xff]   ;;  %v1952_v46 = vld [vmem:[#allocation6 + $0x160] ss:$16 sps:$4 sm:$0xff]  }
  0x69   : > { %v1953_v47 = vld [vmem:[#allocation6 + $0x168] ss:$16 sps:$4 sm:$0xff]   ;;  %v1980_v48 = vld [vmem:[%s2434_s14 + $0x4] ss:$16 sps:$4 sm:$0xff]   ;;  %v1956_v50 = vld [vmem:[#allocation6 + $0x18c] ss:$16 sps:$4 sm:$0xff]  }
  0x6a   : > { %v1954_v49 = vld [vmem:[#allocation6 + $0x184] ss:$16 sps:$4 sm:$0xff]   ;;  %1151 = vmatprep.mubr.bf16.mxu0 %v1980_v48  ;;  %1237 = vmatprep.mubr.bf16.mxu1 %v1980_v48  ;;  %v1958_v51 = vld [vmem:[#allocation6 + $0x180] ss:$16 sps:$4 sm:$0xff]   ;;  %v1959_v52 = vld [vmem:[#allocation6 + $0x188] ss:$16 sps:$4 sm:$0xff]  }
  0x6b   : > { %1128 = vmatpush1.bf16.msra.mxu0 %v1910_v18  ;;  %1214 = vmatpush1.bf16.msra.mxu1 %v1911_v19  ;;  %v1960_v53 = vld [vmem:[#allocation6 + $0x1a4] ss:$16 sps:$4 sm:$0xff]   ;;  %v1962_v54 = vld [vmem:[#allocation6 + $0x1ac] ss:$16 sps:$4 sm:$0xff]   ;;  %v1964_v55 = vld [vmem:[#allocation6 + $0x1a0] ss:$16 sps:$4 sm:$0xff]  }
  0x6c   : > { %1129 = vmatprep.subr.bf16.mxu0 %v1912_v20  ;;  %1215 = vmatprep.subr.bf16.mxu1 %v1914_v21  ;;  %v1965_v56 = vld [vmem:[#allocation6 + $0x1a8] ss:$16 sps:$4 sm:$0xff]   ;;  %v1966_v57 = vld [vmem:[#allocation6 + $0x1c4] ss:$16 sps:$4 sm:$0xff]   ;;  %v1968_v58 = vld [vmem:[#allocation6 + $0x1cc] ss:$16 sps:$4 sm:$0xff]  }
  0x6d   : > { %v1970_v59 = vld [vmem:[#allocation6 + $0x1c0] ss:$16 sps:$4 sm:$0xff]   ;;  %v1971_v60 = vld [vmem:[#allocation6 + $0x1c8] ss:$16 sps:$4 sm:$0xff]   ;;  %v1972_v61 = vld [vmem:[#allocation6 + $0x1e4] ss:$16 sps:$4 sm:$0xff]  }
  0x6e   : > { %v1974_v62 = vld [vmem:[#allocation6 + $0x1ec] ss:$16 sps:$4 sm:$0xff]   ;;  %v1976_v63 = vld [vmem:[#allocation6 + $0x1e0] ss:$16 sps:$4 sm:$0xff]   ;;  %v1977_v0 = vld [vmem:[#allocation6 + $0x1e8] ss:$16 sps:$4 sm:$0xff]  }
  0x6f   : > { %1130 = vmatpush1.bf16.msra.mxu0 %v1916_v22  ;;  %1216 = vmatpush1.bf16.msra.mxu1 %v1917_v23  ;;  %v1983_v1 = vld [vmem:[#allocation6 + $0x204] ss:$16 sps:$4 sm:$0xff]   ;;  %v1986_v2 = vld [vmem:[#allocation6 + $0x20c] ss:$16 sps:$4 sm:$0xff]   ;;  %v1978_v3 = vld [vmem:[%s2434_s14] ss:$16 sps:$4 sm:$0xff]  }
  0x70   : > { %1131 = vmatprep.subr.bf16.mxu0 %v1918_v24  ;;  %1217 = vmatprep.subr.bf16.mxu1 %v1920_v25  ;;  %v1981_v4 = vld [vmem:[#allocation6 + $0x200] ss:$16 sps:$4 sm:$0xff]   ;;  %v1984_v5 = vld [vmem:[#allocation6 + $0x208] ss:$16 sps:$4 sm:$0xff]   ;;  %v1989_v6 = vld [vmem:[#allocation6 + $0x224] ss:$16 sps:$4 sm:$0xff]  }
  0x71   : > { %v1992_v7 = vld [vmem:[#allocation6 + $0x22c] ss:$16 sps:$4 sm:$0xff]   ;;  %v1987_v8 = vld [vmem:[#allocation6 + $0x220] ss:$16 sps:$4 sm:$0xff]   ;;  %v1990_v9 = vld [vmem:[#allocation6 + $0x228] ss:$16 sps:$4 sm:$0xff]  }
  0x72   : > { %v1995_v10 = vld [vmem:[#allocation6 + $0x244] ss:$16 sps:$4 sm:$0xff]   ;;  %v1998_v11 = vld [vmem:[#allocation6 + $0x24c] ss:$16 sps:$4 sm:$0xff]   ;;  %v1993_v12 = vld [vmem:[#allocation6 + $0x240] ss:$16 sps:$4 sm:$0xff]  }
  0x73   : > { %1132 = vmatpush1.bf16.msra.mxu0 %v1922_v26  ;;  %1218 = vmatpush1.bf16.msra.mxu1 %v1923_v27  ;;  %v1996_v13 = vld [vmem:[#allocation6 + $0x248] ss:$16 sps:$4 sm:$0xff]   ;;  %v2001_v14 = vld [vmem:[#allocation6 + $0x264] ss:$16 sps:$4 sm:$0xff]   ;;  %v2004_v15 = vld [vmem:[#allocation6 + $0x26c] ss:$16 sps:$4 sm:$0xff]  }
  0x74   : > { %1133 = vmatprep.subr.bf16.mxu0 %v1924_v28  ;;  %1219 = vmatprep.subr.bf16.mxu1 %v1926_v29  ;;  %v1999_v16 = vld [vmem:[#allocation6 + $0x260] ss:$16 sps:$4 sm:$0xff]   ;;  %v2002_v17 = vld [vmem:[#allocation6 + $0x268] ss:$16 sps:$4 sm:$0xff]   ;;  %v2007_v18 = vld [vmem:[#allocation6 + $0x284] ss:$16 sps:$4 sm:$0xff]  }
  0x75   : > { %v2010_v19 = vld [vmem:[#allocation6 + $0x28c] ss:$16 sps:$4 sm:$0xff]   ;;  %v2005_v20 = vld [vmem:[#allocation6 + $0x280] ss:$16 sps:$4 sm:$0xff]   ;;  %v2008_v21 = vld [vmem:[#allocation6 + $0x288] ss:$16 sps:$4 sm:$0xff]  }
  0x76   : > { %v2013_v22 = vld [vmem:[#allocation6 + $0x2a4] ss:$16 sps:$4 sm:$0xff]   ;;  %v2016_v23 = vld [vmem:[#allocation6 + $0x2ac] ss:$16 sps:$4 sm:$0xff]   ;;  %v2011_v24 = vld [vmem:[#allocation6 + $0x2a0] ss:$16 sps:$4 sm:$0xff]  }
  0x77   : > { %1134 = vmatpush1.bf16.msra.mxu0 %v1928_v30  ;;  %1220 = vmatpush1.bf16.msra.mxu1 %v1929_v31  ;;  %v2014_v25 = vld [vmem:[#allocation6 + $0x2a8] ss:$16 sps:$4 sm:$0xff]   ;;  %v2019_v26 = vld [vmem:[#allocation6 + $0x2c4] ss:$16 sps:$4 sm:$0xff]   ;;  %v2022_v27 = vld [vmem:[#allocation6 + $0x2cc] ss:$16 sps:$4 sm:$0xff]  }
  0x78   : > { %1135 = vmatprep.subr.bf16.mxu0 %v1930_v32  ;;  %1221 = vmatprep.subr.bf16.mxu1 %v1932_v33  ;;  %v2079_v28 = vld [vmem:[%s2434_s14 + $0xc] ss:$16 sps:$4 sm:$0xff]   ;;  %v2017_v29 = vld [vmem:[#allocation6 + $0x2c0] ss:$16 sps:$4 sm:$0xff]   ;;  %v2020_v30 = vld [vmem:[#allocation6 + $0x2c8] ss:$16 sps:$4 sm:$0xff]  }
  0x79   : > { %v2025_v31 = vld [vmem:[#allocation6 + $0x2e4] ss:$16 sps:$4 sm:$0xff]   ;;  %v2028_v32 = vld [vmem:[#allocation6 + $0x2ec] ss:$16 sps:$4 sm:$0xff]   ;;  %v2023_v33 = vld [vmem:[#allocation6 + $0x2e0] ss:$16 sps:$4 sm:$0xff]  }
  0x7a   : > { %v2052_v48 = vld [vmem:[#allocation6 + $0x36c] ss:$16 sps:$4 sm:$0xff]   ;;  %p312_p4 = scmp.lt.s32.totalorder %s2224_s21, 1  ;;  %vm1359_vm0 = vcmask 130048   ;;  %vm1507_vm2 = vcmask 1040384   ;;  %s1654_s16 = sshll.u32 %s2430_s12, 3 }
  0x7b   : > { %1136 = vmatpush1.bf16.msra.mxu0 %v1934_v34  ;;  %1222 = vmatpush1.bf16.msra.mxu1 %v1935_v35  ;;  %v2026_v34 = vld [vmem:[#allocation6 + $0x2e8] ss:$16 sps:$4 sm:$0xff]   ;;  %v2031_v35 = vld [vmem:[#allocation6 + $0x304] ss:$16 sps:$4 sm:$0xff]   ;;  %s1791_s6 = sshll.u32 %s2224_s21, 7  ;;  %s306_s17 = scalar_lea.vmem [#allocation8], %s1654_s16 }
  0x7c   : > { %1137 = vmatprep.subr.bf16.mxu0 %v1936_v36  ;;  %1223 = vmatprep.subr.bf16.mxu1 %v1938_v37  ;;  %v2034_v36 = vld [vmem:[#allocation6 + $0x30c] ss:$16 sps:$4 sm:$0xff]   ;;  %v2029_v37 = vld [vmem:[#allocation6 + $0x300] ss:$16 sps:$4 sm:$0xff]   ;;  %s313_s30 = scalar_select %p312_p4, %s2224_s21, 1 }
  0x7d   : > { %s1538_s27 = sshll.u32 %s306_s17, 4  ;;  %s2494_s26 = scalar_lea.hbm %s2548_s5, %s1791_s6  ;;  %s2496_s27 = int_to_ptr.vmem [resolvable:$true] %s1538_s27 }
  0x7e   : > { %s314_s10 = scalar_lea.vmem %s2544_s1, %s313_s30  ;;  %s1523_s28 = scalar_lea.sflag [#allocation5], %s2430_s12 }
  0x7f   : > { %1138 = vmatpush1.bf16.msra.mxu0 %v1940_v38  ;;  %1224 = vmatpush1.bf16.msra.mxu1 %v1941_v39  ;;  %v2032_v38 = vld [vmem:[#allocation6 + $0x308] ss:$16 sps:$4 sm:$0xff]   ;;  %v2037_v39 = vld [vmem:[#allocation6 + $0x324] ss:$16 sps:$4 sm:$0xff]   ;;  %s2146_s30 = scalar_lea.vmem %s2496_s27, 128  ;;  %s2241_s21 = smov [#allocation8]  }
  0x80   : > { %1139 = vmatprep.subr.bf16.mxu0 %v1942_v40  ;;  %1225 = vmatprep.subr.bf16.mxu1 %v1944_v41  ;;  %v2040_v40 = vld [vmem:[#allocation6 + $0x32c] ss:$16 sps:$4 sm:$0xff]   ;;  %v2035_v41 = vld [vmem:[#allocation6 + $0x320] ss:$16 sps:$4 sm:$0xff]   ;;  %p2147_p6 = scmp.ne.s32.totalorder %s2496_s27, %s2146_s30  ;;  %s2150_s24 = sshll.u32 %s2241_s21, 4  ;;  %s2151_s24 = int_to_ptr.vmem [resolvable:$false] %s2150_s24 }
  0x81   : > { %s2152_s25 = scalar_lea.vmem %s2151_s24, 256  ;;  %p2153_p11 = scmp.lt.s32.totalorder %s2496_s27, %s2151_s24 }
  0x82   : > { %p2148_p8 = pnand %p2147_p6, %p2371_p10  ;;  %p2154_p0 = scmp.lt.s32.totalorder %s2152_s25, %s2146_s30 }
  0x83   : > { %1140 = vmatpush1.bf16.msra.mxu0 %v1946_v42  ;;  %1226 = vmatpush1.bf16.msra.mxu1 %v1947_v43  ;;  %v2038_v42 = vld [vmem:[#allocation6 + $0x328] ss:$16 sps:$4 sm:$0xff]   ;;  %v2043_v43 = vld [vmem:[#allocation6 + $0x344] ss:$16 sps:$4 sm:$0xff]  }
  0x84   : > { %1141 = vmatprep.subr.bf16.mxu0 %v1948_v44  ;;  %1227 = vmatprep.subr.bf16.mxu1 %v1950_v45  ;;  %v2046_v44 = vld [vmem:[#allocation6 + $0x34c] ss:$16 sps:$4 sm:$0xff]   ;;  %v2041_v45 = vld [vmem:[#allocation6 + $0x340] ss:$16 sps:$4 sm:$0xff]   ;;  %p2149_p12 = pneg %p2148_p8  ;;  %p2155_p5 = por %p2154_p0, %p2153_p11 }
  0x86   : > { %p2156_p9 = pnand %p2155_p5, %p2149_p12 }
  0x87   : > { %1142 = vmatpush1.bf16.msra.mxu0 %v1952_v46  ;;  %1228 = vmatpush1.bf16.msra.mxu1 %v1953_v47  ;;  %v2044_v46 = vld [vmem:[#allocation6 + $0x348] ss:$16 sps:$4 sm:$0xff]   ;;  %v2049_v47 = vld [vmem:[#allocation6 + $0x364] ss:$16 sps:$4 sm:$0xff]  }
  0x88   : > { %1143 = vmatprep.subr.bf16.mxu0 %v1954_v49  ;;  %1229 = vmatprep.subr.bf16.mxu1 %v1956_v50  ;;  %v2047_v49 = vld [vmem:[#allocation6 + $0x360] ss:$16 sps:$4 sm:$0xff]   ;;  %v2050_v50 = vld [vmem:[#allocation6 + $0x368] ss:$16 sps:$4 sm:$0xff]  }
  0x8b   : > { %1144 = vmatpush1.bf16.msra.mxu0 %v1958_v51  ;;  %1230 = vmatpush1.bf16.msra.mxu1 %v1959_v52  ;;  %v2055_v51 = vld [vmem:[#allocation6 + $0x384] ss:$16 sps:$4 sm:$0xff]   ;;  %v2058_v52 = vld [vmem:[#allocation6 + $0x38c] ss:$16 sps:$4 sm:$0xff]  }
  0x8c   : > { %1145 = vmatprep.subr.bf16.mxu0 %v1960_v53  ;;  %1231 = vmatprep.subr.bf16.mxu1 %v1962_v54  ;;  %v2053_v53 = vld [vmem:[#allocation6 + $0x380] ss:$16 sps:$4 sm:$0xff]   ;;  %v2056_v54 = vld [vmem:[#allocation6 + $0x388] ss:$16 sps:$4 sm:$0xff]  }
  0x8f   : > { %1146 = vmatpush1.bf16.msra.mxu0 %v1964_v55  ;;  %1232 = vmatpush1.bf16.msra.mxu1 %v1965_v56  ;;  %v2061_v55 = vld [vmem:[#allocation6 + $0x3a4] ss:$16 sps:$4 sm:$0xff]   ;;  %v2064_v56 = vld [vmem:[#allocation6 + $0x3ac] ss:$16 sps:$4 sm:$0xff]  }
  0x90   : > { %1147 = vmatprep.subr.bf16.mxu0 %v1966_v57  ;;  %1233 = vmatprep.subr.bf16.mxu1 %v1968_v58  ;;  %v2059_v57 = vld [vmem:[#allocation6 + $0x3a0] ss:$16 sps:$4 sm:$0xff]   ;;  %v2062_v58 = vld [vmem:[#allocation6 + $0x3a8] ss:$16 sps:$4 sm:$0xff]  }
  0x93   : > { %1148 = vmatpush1.bf16.msra.mxu0 %v1970_v59  ;;  %1234 = vmatpush1.bf16.msra.mxu1 %v1971_v60  ;;  %v2067_v59 = vld [vmem:[#allocation6 + $0x3c4] ss:$16 sps:$4 sm:$0xff]   ;;  %v2070_v60 = vld [vmem:[#allocation6 + $0x3cc] ss:$16 sps:$4 sm:$0xff]  }
  0x94   : > { %1149 = vmatprep.subr.bf16.mxu0 %v1972_v61  ;;  %1235 = vmatprep.subr.bf16.mxu1 %v1974_v62  ;;  %v2065_v61 = vld [vmem:[#allocation6 + $0x3c0] ss:$16 sps:$4 sm:$0xff]   ;;  %v2068_v62 = vld [vmem:[#allocation6 + $0x3c8] ss:$16 sps:$4 sm:$0xff]  }
  0x97   : > { %1150 = vmatpush1.bf16.msra.mxu0 %v1976_v63  ;;  %1236 = vmatpush1.bf16.msra.mxu1 %v1977_v0  ;;  %v2073_v63 = vld [vmem:[#allocation6 + $0x3e4] ss:$16 sps:$4 sm:$0xff]   ;;  %v2076_v0 = vld [vmem:[#allocation6 + $0x3ec] ss:$16 sps:$4 sm:$0xff]  }
  0x98   : > { %1162 = vmatprep.subr.bf16.mxu0 %v1983_v1  ;;  %1248 = vmatprep.subr.bf16.mxu1 %v1986_v2  ;;  %v2071_v1 = vld [vmem:[#allocation6 + $0x3e0] ss:$16 sps:$4 sm:$0xff]   ;;  %v2074_v2 = vld [vmem:[#allocation6 + $0x3e8] ss:$16 sps:$4 sm:$0xff]  }
  0x9a   : > { %1152 = vmatmul.mubr.bf16.vlgmr.msra.gmra.mrb[0].mxu0 %v1978_v3  ;;  %1238 = vmatmul.mubr.bf16.vlgmr.msra.gmra.mrb[0].mxu1 %v1978_v3  ;;  %v2077_v3 = vld [vmem:[%s2434_s14 + $0x8] ss:$16 sps:$4 sm:$0xff]  }
  0x9b   : > { %1163 = vmatpush1.bf16.msra.mxu0 %v1981_v4  ;;  %1249 = vmatpush1.bf16.msra.mxu1 %v1984_v5  ;;  %v2238_v4 = vmov 0   ;;  %v322_v5 = vlaneseq }
  0x9c   : > { %1164 = vmatprep.subr.bf16.mxu0 %v1989_v6  ;;  %1250 = vmatprep.subr.bf16.mxu1 %v1992_v7  ;;  %v2239_v6 = vmov 1966171168  }
  0x9d   : > { %1194 = vmatprep.mubr.bf16.mxu0 %v2079_v28  ;;  %1280 = vmatprep.mubr.bf16.mxu1 %v2079_v28  ;;  %v1306_v7 = vunpack.c.l.s4 %v2239_v6  ;;  %vm2470_vm1 = vcmp.lt.s32.totalorder %v322_v5, 512 }
  0x9f   : > { %1165 = vmatpush1.bf16.msra.mxu0 %v1987_v8  ;;  %1251 = vmatpush1.bf16.msra.mxu1 %v1990_v9  ;;  %v1307_v8 = vunpack.c.0.s8 %v1306_v7  ;;  %v2448_v9 = vshrl.u32 %v322_v5, 7 }
  0xa0   : > { %1166 = vmatprep.subr.bf16.mxu0 %v1995_v10  ;;  %1252 = vmatprep.subr.bf16.mxu1 %v1998_v11  ;;  %v1787_v10 = vld.sshfl [vmem:[%s2546_s3] sm:$0x33 pattern:$0x75316420] }
  0xa1   : > { %v2454_v11 = vsub.s32 %v1307_v8, %v2448_v9  ;;  %v1501_v6 = vsub.s32 3, %v2448_v9 }
  0xa3   : > { %1167 = vmatpush1.bf16.msra.mxu0 %v1993_v12  ;;  %1253 = vmatpush1.bf16.msra.mxu1 %v1996_v13  ;;  %v1304_v12 = vcombine.high %v1787_v10, %v1787_v10 }
  0xa4   : > { %1168 = vmatprep.subr.bf16.mxu0 %v2001_v14  ;;  %1254 = vmatprep.subr.bf16.mxu1 %v2004_v15  ;;  %v1311_v14 = vrot.slane %v1787_v10, %v2454_v11 }
  0xa5   : > { %v1318_v13 = vrot.slane %v1304_v12, %v2454_v11 }
  0xa7   : > { %1169 = vmatpush1.bf16.msra.mxu0 %v1999_v16  ;;  %1255 = vmatpush1.bf16.msra.mxu1 %v2002_v17  ;;  %v1320_v15 = vcombine.high %v1318_v13, %v1318_v13  ;;  %v1319_v16 = vcombine.high %v1311_v14, %v1311_v14  ;;  %v1322_v17 = vpack.i.b16 %v1311_v14, %v1311_v14 }
  0xa8   : > { %1170 = vmatprep.subr.bf16.mxu0 %v2007_v18  ;;  %1256 = vmatprep.subr.bf16.mxu1 %v2010_v19  ;;  %v2459_v18 = vsub.s32 0, %v2448_v9  ;;  %v1329_v19 = vpack.i.b16 %v1318_v13, %v1318_v13 }
  0xab   : > { %1171 = vmatpush1.bf16.msra.mxu0 %v2005_v20  ;;  %1257 = vmatpush1.bf16.msra.mxu1 %v2008_v21  ;;  %v1343_v20 = vpack.i.b16 %v1320_v15, %v1320_v15  ;;  %v1336_v21 = vpack.i.b16 %v1319_v16, %v1319_v16 }
  0xac   : > { %1172 = vmatprep.subr.bf16.mxu0 %v2013_v22  ;;  %1258 = vmatprep.subr.bf16.mxu1 %v2016_v23 }
  0xaf   : > { %1173 = vmatpush1.bf16.msra.mxu0 %v2011_v24  ;;  %1259 = vmatpush1.bf16.msra.mxu1 %v2014_v25 }
  0xb0   : > { %1174 = vmatprep.subr.bf16.mxu0 %v2019_v26  ;;  %1260 = vmatprep.subr.bf16.mxu1 %v2022_v27  ;;  %v1327_v26 = vrot.slane %v1322_v17, %v2459_v18 }
  0xb3   : > { %1175 = vmatpush1.bf16.msra.mxu0 %v2017_v29  ;;  %1261 = vmatpush1.bf16.msra.mxu1 %v2020_v30  ;;  %v1334_v29 = vrot.slane %v1329_v19, %v2459_v18  ;;  %v1348_v30 = vrot.slane %v1343_v20, %v2459_v18 }
  0xb4   : > { %1176 = vmatprep.subr.bf16.mxu0 %v2025_v31  ;;  %1262 = vmatprep.subr.bf16.mxu1 %v2028_v32 }
  0xb7   : > { %1177 = vmatpush1.bf16.msra.mxu0 %v2023_v33  ;;  %1263 = vmatpush1.bf16.msra.mxu1 %v2026_v34  ;;  %v1341_v33 = vrot.slane %v1336_v21, %v2459_v18 }
  0xb8   : > { %1178 = vmatprep.subr.bf16.mxu0 %v2031_v35  ;;  %1264 = vmatprep.subr.bf16.mxu1 %v2034_v36 }
  0xbb   : > { %1179 = vmatpush1.bf16.msra.mxu0 %v2029_v37  ;;  %1265 = vmatpush1.bf16.msra.mxu1 %v2032_v38 }
  0xbc   : > { %1180 = vmatprep.subr.bf16.mxu0 %v2037_v39  ;;  %1266 = vmatprep.subr.bf16.mxu1 %v2040_v40 }
  0xbf   : > { %1181 = vmatpush1.bf16.msra.mxu0 %v2035_v41  ;;  %1267 = vmatpush1.bf16.msra.mxu1 %v2038_v42 }
  0xc0   : > { %1182 = vmatprep.subr.bf16.mxu0 %v2043_v43  ;;  %1268 = vmatprep.subr.bf16.mxu1 %v2046_v44 }
  0xc3   : > { %1183 = vmatpush1.bf16.msra.mxu0 %v2041_v45  ;;  %1269 = vmatpush1.bf16.msra.mxu1 %v2044_v46  ;;  %v1358_v46 = vld [vmem:[%s314_s10] sm:$0x1] }
  0xc4   : > { %1184 = vmatprep.subr.bf16.mxu0 %v2049_v47  ;;  %1270 = vmatprep.subr.bf16.mxu1 %v2052_v48  ;;  %v2240_v48 = vmov 0.0  }
  0xc5   : > { %326 = vst.msk [vmem:[#allocation2] sm:$0xf] %vm2470_vm1, %v2240_v48 }
  0xc7   : > { %1185 = vmatpush1.bf16.msra.mxu0 %v2047_v49  ;;  %1271 = vmatpush1.bf16.msra.mxu1 %v2050_v50 }
  0xc8   : > { %1186 = vmatprep.subr.bf16.mxu0 %v2055_v51  ;;  %1272 = vmatprep.subr.bf16.mxu1 %v2058_v52 }
  0xcb   : > { %1187 = vmatpush1.bf16.msra.mxu0 %v2053_v53  ;;  %1273 = vmatpush1.bf16.msra.mxu1 %v2056_v54 }
  0xcc   : > { %1188 = vmatprep.subr.bf16.mxu0 %v2061_v55  ;;  %1274 = vmatprep.subr.bf16.mxu1 %v2064_v56 }
  0xcf   : > { %1189 = vmatpush1.bf16.msra.mxu0 %v2059_v57  ;;  %1275 = vmatpush1.bf16.msra.mxu1 %v2062_v58 }
  0xd0   : > { %1190 = vmatprep.subr.bf16.mxu0 %v2067_v59  ;;  %1276 = vmatprep.subr.bf16.mxu1 %v2070_v60 }
  0xd3   : > { %1191 = vmatpush1.bf16.msra.mxu0 %v2065_v61  ;;  %1277 = vmatpush1.bf16.msra.mxu1 %v2068_v62  ;;  %v1357_v62 = vld [vmem:[#allocation2] sm:$0xf] }
  0xd4   : > { %1192 = vmatprep.subr.bf16.mxu0 %v2073_v63  ;;  %1278 = vmatprep.subr.bf16.mxu1 %v2076_v0 }
  0xd7   : > { %1193 = vmatpush1.bf16.msra.mxu0 %v2071_v1  ;;  %1279 = vmatpush1.bf16.msra.mxu1 %v2074_v2  ;;  %v1484_v1 = vld [vmem:[%s2547_s4] sm:$0xf]  ;;  %v1493_v2 = vsub.s32 1, %v2448_v9 }
  0xda   : > { %1195 = vmatmul.mubr.bf16.vlgmr.msra.gmra.mrb[0].mxu0 %v2077_v3  ;;  %1281 = vmatmul.mubr.bf16.vlgmr.msra.gmra.mrb[0].mxu1 %v2077_v3  ;;  %v1497_v3 = vsub.s32 2, %v2448_v9 }
  0xdb   : > { %1395 = vmatprep.mubr.bf16.mxu0 %v2238_v4  ;;  %1436 = vmatprep.mubr.bf16.mxu1 %v2238_v4 }
 0x1ad   : > { %v1196_v22 = vpop.f32.mrb[0].mxu0  ;;  %v1282_v23 = vpop.f32.mrb[0].mxu1 }
 0x1ae   : > { %v1198_v24 = vpop.f32.mrb[1].mxu0  ;;  %v1284_v25 = vpop.f32.mrb[1].mxu1 }
 0x1af   : > { %v1200_v27 = vpop.f32.mrb[2].mxu0  ;;  %v1286_v28 = vpop.f32.mrb[2].mxu1 }
 0x1b0   : > { %v1291_v31 = vpack.c.bf16 %v1200_v27, %v1196_v22  ;;  %v1293_v32 = vpack.c.bf16 %v1286_v28, %v1282_v23  ;;  %v1202_v34 = vpop.f32.mrb[3].mxu0  ;;  %v1288_v35 = vpop.f32.mrb[3].mxu1 }
 0x1b1   : > { %v1292_v36 = vpack.c.bf16 %v1202_v34, %v1198_v24  ;;  %v1294_v37 = vpack.c.bf16 %v1288_v35, %v1284_v25 }
 0x1b2   : > { %v1349_v38 = vadd.bf16 %v1327_v26, %v1291_v31  ;;  %v1351_v41 = vadd.bf16 %v1341_v33, %v1293_v32 }
 0x1b3   : > { %v1350_v39 = vadd.bf16 %v1334_v29, %v1292_v36  ;;  %v1352_v40 = vadd.bf16 %v1348_v30, %v1294_v37 }
 0x1b4   : > { %2080 = vtanh.bf16 %v1349_v38 }
 0x1b5   : > { %2082 = vtanh.bf16 %v1350_v39 }
 0x1b6   : > { %2084 = vtanh.bf16 %v1352_v40 }
 0x1b7   : > { %2086 = vtanh.bf16 %v1351_v41 }
 0x1bf   : > { %v2081_v42 = vpop.eup %2080 }
 0x1c0   : > { %v2083_v43 = vpop.eup %2082 }
 0x1c1   : > { %v2085_v44 = vpop.eup %2084  ;;  %1363 = vmatprep.subr.bf16.mxu0 %v2083_v43 }
 0x1c2   : > { %v2087_v45 = vpop.eup %2086  ;;  %1404 = vmatprep.subr.bf16.mxu1 %v2085_v44  ;;  %1364 = vmatpush1.bf16.msra.mxu0 %v2081_v42 }
 0x1c3   : > { %1405 = vmatpush1.bf16.msra.mxu1 %v2087_v45 }
 0x1c5   : > { %1788 = vmatmul.mubr.msk.bf16.vlgmr.msra.gmra.mrb[4].mxu0 %vm1359_vm0, %v1358_v46 }
 0x1c6   : > { %1789 = vmatmul.mubr.msk.bf16.vlgmr.msra.gmra.mrb[4].mxu1 %vm1359_vm0, %v1358_v46 }
 0x298   : > { %v1397_v49 = vpop.f32.mrb[4].mxu0 }
 0x299   : > { %v1438_v50 = vpop.f32.mrb[4].mxu1  ;;  %v1399_v51 = vpop.f32.mrb[5].mxu0 }
 0x29a   : > { %v1449_v52 = vcombine.low %v1397_v49, %v1399_v51  ;;  %v1440_v53 = vpop.f32.mrb[5].mxu1  ;;  %v1401_v54 = vpop.f32.mrb[6].mxu0 }
 0x29b   : > { %v1450_v55 = vcombine.low %v1438_v50, %v1440_v53  ;;  %v1442_v56 = vpop.f32.mrb[6].mxu1  ;;  %v1402_v57 = vpop.f32.mrb[7].mxu0 }
 0x29c   : > { %v1457_v58 = vrot.slane %v1449_v52, %v2454_v11  ;;  %v1443_v59 = vpop.f32.mrb[7].mxu1 }
 0x29d   : > { %v1464_v60 = vrot.slane %v1450_v55, %v2454_v11 }
 0x29f   : > { %v1465_v61 = vcombine.low %v1457_v58, %v1464_v60 }
 0x2a1   : > { %v1472_v63 = vrot.slane %v1465_v61, %v2454_v11 }
 0x2a3   : > { %v1474_v0 = vadd.f32 %v1472_v63, %v1357_v62 }
 0x2a5   : > { %1479 = vst.msk [vmem:[#allocation2] sm:$0xf] %vm2470_vm1, %v1474_v0 }
 0x2ac   : > { %v1483_v4 = vld [vmem:[#allocation2] sm:$0xf] }
 0x2ad   : > { %v1485_v5 = vmul.f32 %v1484_v1, %v1483_v4 }
 0x2af   : > { %v1490_v7 = vrot.slane %v1485_v5, %v2459_v18  ;;  %v1494_v8 = vrot.slane %v1485_v5, %v1493_v2  ;;  %v1498_v10 = vrot.slane %v1485_v5, %v1497_v3  ;;  %v1502_v11 = vrot.slane %v1485_v5, %v1501_v6 }
 0x2b1   : > { %v1508_v12 = vsel %vm1507_vm2, %v1490_v7, 0.0  ;;  %v1509_v13 = vsel %vm1507_vm2, %v1494_v8, 0.0  ;;  %v1511_v15 = vsel %vm1507_vm2, %v1498_v10, 0.0  ;;  %v1513_v17 = vsel %vm1507_vm2, %v1502_v11, 0.0 }
 0x2b2   : > { %v1510_v14 = vadd.f32 %v1509_v13, %v1508_v12 }
 0x2b4   : > { %v1512_v16 = vadd.f32 %v1511_v15, %v1510_v14 }
 0x2b6   : > { %v1514_v19 = vadd.f32 %v1513_v17, %v1512_v16 }
 0x2b8   : > { %1515 = vadd.xlane.f32.xlu0 %v1514_v19 }
 0x345   : > { %v1516_v9 = vpop.xlane.xlu0 %1515 }
 0x346   : > { %v1520_v20 = vrot.slane %v1516_v9, %v2459_v18 }
 0x348   : > { %1521 = vst [vmem:[%s306_s17] sm:$0xff] %v1520_v20 }
 0x349   : > { %2159 = shalt.err (!%p2156_p9)
}
 0x34a   : > { %s2160_s12 = scalar_lea.hbm %s2494_s26, 128  ;;  %s2164_s11 = scalar_lea.hbm %s2548_s5, 256 }
 0x34b   : > { %p2161_p1 = scmp.ne.s32.totalorder %s2494_s26, %s2160_s12  ;;  %p2165_p7 = scmp.lt.u32.totalorder %s2494_s26, %s2548_s5 }
 0x34c   : > { %p2166_p13 = scmp.lt.u32.totalorder %s2164_s11, %s2160_s12  ;;  %p2168_p6 = scmp.lt.u32.totalorder %s2160_s12, %s2494_s26 }
 0x34d   : > { %p2162_p2 = pnand %p2161_p1, %p2371_p10 }
 0x34e   : > { %p2167_p4 = por %p2166_p13, %p2165_p7 }
 0x34f   : > { %p2163_p3 = pneg %p2162_p2 }
 0x350   : > { %p2169_p8 = por %p2168_p6, %p2167_p4 }
 0x352   : > { %p2170_p12 = pnand %p2169_p8, %p2163_p3 }
 0x354   : > { %2173 = shalt.err (!%p2170_p12)
}
 0x355   : > { %1810 = dma.vmem_to_hbm [thread:$0]  (%p2371_p10), %s2496_s27, 128, %s2494_s26, %s1523_s28  }
 0x356 PF: > { %s1550_s17 = sand.u32 1, %s2212_s18   ;;  %p2570_p11 = scmp.ne.s32.totalorder %s2557_s29, 0 }
 0x357   : > { %p2571_p0 = scmp.ge.s32.totalorder %s2232_s23, 2  ;;  %s1551_s7 = scalar_lea.sflag [#allocation5], %s1550_s17 }
 0x359   : > { %p1821_p5 = pnand %p2571_p0, %p2570_p11 }
 0x35b   : > { %2207 = dma.done.wait (!%p1821_p5), %s1551_s7, 128  }
 0x35c   : > { %2209 = vsyncadd (!%p1821_p5), %s1551_s7, 4294967168  ;;  %s22_s23 = sadd.s32 1, %s2232_s23   ;;  %s2572_s18 = smov %s2216_s19 }
 0x35d   : > { %p19_p9 = scmp.ge.s32.totalorder %s22_s23, 4   ;;  %s2573_s19 = smov %s2220_s20 }
 0x35e   : > { %s2574_s20 = smov %s2380_s15  ;;  %s2575_s21 = smov %s2228_s22 }
 0x35f   : > { %s2576_s22 = smov %s2578_s9  ;;  %21 = sbr.rel (!%p19_p9) target bundleno = 7 (0x7), region = 100 }
 0x366   :  { %1556 = vsyncpa [#allocation4], 1 }
 0x367   :  { %1558 = vsyncpa [#allocation4 + $0x1], 1 }
 0x368   :  { %1559 = vsyncpa [#allocation7], 1 }
 0x369   :  { %1560 = vsyncpa [#allocation5], 1 }
 0x36a   :  { %1562 = vsyncpa [#allocation5 + $0x1], 1 }

</bundles_post_ra>
